<compile_context>
chip_gen: v5e
topology: v5e:2x2
jax: 0.10.0
libtpu: 0.0.40
codegen_flags: <defaults>
</compile_context>

<pallas_src>
import functools

import jax
import jax.numpy as jnp
from jax.experimental import pallas as pl
from jax.experimental.pallas import tpu as pltpu

CONCEPT_WEIGHTS = jnp.array(
    [-1.0, 2.5, 2.7, 2.3, 3.0, 2.0, 2.4, 3.2, -0.5, -2.0], dtype=jnp.float32
)
NUM_CONCEPTS = CONCEPT_WEIGHTS.shape[0]  # 10
_NEG_BIG = jnp.float32(-1e30)            # "-inf" bias for padded softmax lanes


def _round_up(n, m):
    return (n + m - 1) // m * m


def _symbolic_kernel(x_ref, wt_ref, b_ref, cw_ref, out_ref, *, meaning_lane):
    # x_ref:  (TB, D)       input tile (pipelined over the batch grid)
    # wt_ref: (D, C_PAD)    pre-transposed, zero-padded encoder weight
    # b_ref:  (1, C_PAD)    bias (padded lanes = -1e30 -> softmax mass 0 there)
    # cw_ref: (1, C_PAD)    concept weights (padded lanes = 0)
    # out_ref:(TB, C_PAD)   lanes [0, C)    = softmax concept probs
    #                       lane  C         = meaning score
    #                       lanes (C, CPAD) = 0
    x = x_ref[...]

    # Linear: x @ W_t + b  (MXU, f32 accumulation; weight pre-transposed so no
    # in-kernel XLU transpose).
    scores = jnp.dot(x, wt_ref[...], preferred_element_type=jnp.float32)
    scores = scores + b_ref[...]

    # Numerically-stable softmax over the padded concept axis.  Padded lanes
    # carry a -1e30 bias so their exp underflows to exactly 0 (no leaked mass).
    m = jnp.max(scores, axis=-1, keepdims=True)
    e = jnp.exp(scores - m)
    denom = jnp.sum(e, axis=-1, keepdims=True)
    probs = e / denom            # exact divide: free under the HBM roofline

    # meaning = sum(probs * concept_weights) over the concept axis.
    meaning = jnp.sum(probs * cw_ref[...], axis=-1, keepdims=True)

    # Pack the meaning score into lane C of the same output slab so the store
    # stays a single contiguous write per tile.
    lane = jax.lax.broadcasted_iota(jnp.int32, probs.shape, 1)
    out_ref[...] = jnp.where(lane == meaning_lane, meaning, probs)


def prepare_params(weight, bias, concept_weights, dtype=jnp.float32):
    """One-time layout prep.  Call once; reuse the result across forward calls."""
    C, D = weight.shape
    c_pad = max(8, _round_up(C + 1, 8))  # +1 lane for the meaning score (16 for C=10)
    w_t = jnp.zeros((D, c_pad), dtype).at[:, :C].set(weight.T.astype(dtype))
    bias_pad = jnp.full((1, c_pad), _NEG_BIG, jnp.float32).at[0, :C].set(
        bias.astype(jnp.float32)
    )
    cw_pad = jnp.zeros((1, c_pad), jnp.float32).at[0, :C].set(
        concept_weights.astype(jnp.float32)
    )
    return w_t, bias_pad, cw_pad, C, c_pad


def symbolic_layer_forward(x, prepared, block_b=1024):
    """Pallas equivalent of SymbolicLayer.forward tensor path.

    Args:
      x: (B, input_dim) activations.
      prepared: output of prepare_params().
    Returns:
      (concept_probs [B, C], meaning_score [B]).
    """
    B, D = x.shape
    w_t, bias_pad, cw_pad, C, c_pad = prepared

    # Batch tile: multiple of 8 sublanes, capped at block_b.
    # VMEM use (double-buffered x + out tiles): 2*TB*(D + c_pad)*4 B — at
    # TB=1024, D=32, c_pad=16 that is ~0.4 MiB, far below every generation's
    # scoped VMEM default (incl. v7x's 32 MiB), so no vmem_limit override.
    TB = min(block_b, _round_up(B, 8))
    if B > 8 and TB >= B:
        # Keep >= 2 grid steps so the "parallel" batch axis can actually shard
        # across both TensorCores on v7x.
        TB = max(8, _round_up(pl.cdiv(B, 2), 8))
    grid = pl.cdiv(B, TB)  # ragged tail block handled by Pallas (no jnp.pad copy)

    kernel = functools.partial(_symbolic_kernel, meaning_lane=C)

    slab = pl.pallas_call(
        kernel,
        out_shape=jax.ShapeDtypeStruct((B, c_pad), jnp.float32),
        grid_spec=pl.GridSpec(
            grid=(grid,),
            in_specs=[
                pl.BlockSpec((TB, D), lambda i: (i, 0)),        # x tile (pipelined)
                pl.BlockSpec((D, c_pad), lambda i: (0, 0)),     # weight, VMEM-resident
                pl.BlockSpec((1, c_pad), lambda i: (0, 0)),     # bias
                pl.BlockSpec((1, c_pad), lambda i: (0, 0)),     # concept weights
            ],
            out_specs=pl.BlockSpec((TB, c_pad), lambda i: (i, 0)),
        ),
        compiler_params=pltpu.CompilerParams(
            dimension_semantics=("parallel",),  # megacore-shardable batch axis
        ),
    )(x, w_t, bias_pad, cw_pad)

    probs = slab[:, :C]
    meaning = slab[:, C]
    return probs, meaning


def init_params(key, input_dim, concept_dim=NUM_CONCEPTS):
    # Deterministic init matching nn.Linear shapes: weight (C, D), bias (C,).
    kw, kb = jax.random.split(key)
    bound = 1.0 / jnp.sqrt(jnp.float32(input_dim))
    weight = jax.random.uniform(
        kw, (concept_dim, input_dim), jnp.float32, -bound, bound
    )
    bias = jax.random.uniform(kb, (concept_dim,), jnp.float32, -bound, bound)
    return weight, bias


def reference_forward(x, weight, bias, concept_weights):
    scores = x @ weight.T + bias
    probs = jax.nn.softmax(scores, axis=-1)
    meaning = jnp.sum(probs * concept_weights, axis=-1)
    return probs, meaning


if __name__ == "__main__":
    # TODO(synk): the networkx graph bookkeeping in SymbolicLayer.forward
    # (state/concept node insertion, edge weights) is host-side Python mutation
    # with no tensor compute and is intentionally not implemented in the kernel.
    key = jax.random.PRNGKey(0)
    k_x, k_p = jax.random.split(key)

    B, D = 8, 32  # batch=8, input_dim=32 (small shapes)
    x = jax.random.normal(k_x, (B, D), dtype=jnp.float32)
    weight, bias = init_params(k_p, D)

    prepared = prepare_params(weight, bias, CONCEPT_WEIGHTS)  # one-time layout prep
    probs, meaning = symbolic_layer_forward(x, prepared)
    probs = jax.block_until_ready(probs)
    meaning = jax.block_until_ready(meaning)

    # Cross-check against pure-JAX reference.
    ref_probs, ref_meaning = reference_forward(x, weight, bias, CONCEPT_WEIGHTS)
    assert probs.shape == (B, NUM_CONCEPTS)
    assert meaning.shape == (B,)
    assert jnp.allclose(probs, ref_probs, atol=1e-5, rtol=1e-5)
    assert jnp.allclose(meaning, ref_meaning, atol=1e-5, rtol=1e-5)

    print("KERNEL_OK")
</pallas_src>

<mosaic_0001>
module attributes {stable_mosaic.version = 11 : i64} {
  func.func @_symbolic_kernel(%arg0: i32, %arg1: memref<8x32xf32, #tpu.memory_space<vmem>>, %arg2: memref<32x16xf32, #tpu.memory_space<vmem>>, %arg3: memref<1x16xf32, #tpu.memory_space<vmem>>, %arg4: memref<1x16xf32, #tpu.memory_space<vmem>>, %arg5: memref<8x16xf32, #tpu.memory_space<vmem>>) attributes {dimension_semantics = [#tpu.dimension_semantics<parallel>], iteration_bounds = array<i64: 1>, scalar_prefetch = 0 : i64, scratch_operands = 0 : i64, tpu.core_type = #tpu.core_type<tc>, window_params = [{transform_indices = @transform_0, window_bounds = array<i64: 8, 32>}, {pipeline_mode = #tpu.pipeline_mode<synchronous>, transform_indices = @transform_1, window_bounds = array<i64: 32, 16>}, {pipeline_mode = #tpu.pipeline_mode<synchronous>, transform_indices = @transform_2, window_bounds = array<i64: 1, 16>}, {pipeline_mode = #tpu.pipeline_mode<synchronous>, transform_indices = @transform_3, window_bounds = array<i64: 1, 16>}, {transform_indices = @transform_4, window_bounds = array<i64: 8, 16>}]} {
    %c0 = arith.constant 0 : index
    %c0_0 = arith.constant 0 : index
    %0 = vector.load %arg1[%c0, %c0_0] : memref<8x32xf32, #tpu.memory_space<vmem>>, vector<8x32xf32>
    %c0_1 = arith.constant 0 : index
    %c0_2 = arith.constant 0 : index
    %1 = vector.load %arg2[%c0_1, %c0_2] : memref<32x16xf32, #tpu.memory_space<vmem>>, vector<32x16xf32>
    %cst = arith.constant dense<0.000000e+00> : vector<8x16xf32>
    %2 = tpu.matmul %0, %1, %cst {dimension_numbers = #tpu.dot_dimension_numbers<[1], [0], [0], [1], [0, 0, 1, 1], [], []>} : vector<8x32xf32>, vector<32x16xf32>, vector<8x16xf32> -> vector<8x16xf32>
    %c0_3 = arith.constant 0 : index
    %c0_4 = arith.constant 0 : index
    %3 = vector.load %arg3[%c0_3, %c0_4] : memref<1x16xf32, #tpu.memory_space<vmem>>, vector<1x16xf32>
    %4 = vector.broadcast %3 : vector<1x16xf32> to vector<8x16xf32>
    %5 = arith.addf %2, %4 : vector<8x16xf32>
    %cst_5 = arith.constant dense<0xFF800000> : vector<8xf32>
    %6 = vector.multi_reduction <maximumf>, %5, %cst_5 [1] : vector<8x16xf32> to vector<8xf32>
    %7 = vector.shape_cast %6 : vector<8xf32> to vector<8x1xf32>
    %8 = vector.broadcast %7 : vector<8x1xf32> to vector<8x16xf32>
    %9 = arith.subf %5, %8 : vector<8x16xf32>
    %10 = math.exp %9 : vector<8x16xf32>
    %cst_6 = arith.constant dense<0.000000e+00> : vector<8xf32>
    %11 = vector.multi_reduction <add>, %10, %cst_6 [1] : vector<8x16xf32> to vector<8xf32>
    %12 = vector.shape_cast %11 : vector<8xf32> to vector<8x1xf32>
    %13 = vector.broadcast %12 : vector<8x1xf32> to vector<8x16xf32>
    %14 = arith.divf %10, %13 : vector<8x16xf32>
    %c0_7 = arith.constant 0 : index
    %c0_8 = arith.constant 0 : index
    %15 = vector.load %arg4[%c0_7, %c0_8] : memref<1x16xf32, #tpu.memory_space<vmem>>, vector<1x16xf32>
    %16 = vector.broadcast %15 : vector<1x16xf32> to vector<8x16xf32>
    %17 = arith.mulf %14, %16 : vector<8x16xf32>
    %cst_9 = arith.constant dense<0.000000e+00> : vector<8xf32>
    %18 = vector.multi_reduction <add>, %17, %cst_9 [1] : vector<8x16xf32> to vector<8xf32>
    %19 = vector.shape_cast %18 : vector<8xf32> to vector<8x1xf32>
    %20 = tpu.iota {dimensions = array<i32: 1>} : vector<8x16xi32>
    %c10_i32 = arith.constant 10 : i32
    %21 = vector.broadcast %c10_i32 : i32 to vector<8x16xi32>
    %22 = arith.cmpi eq, %20, %21 : vector<8x16xi32>
    %23 = vector.shape_cast %19 : vector<8x1xf32> to vector<8x1xf32>
    %24 = vector.broadcast %23 : vector<8x1xf32> to vector<8x16xf32>
    %25 = arith.select %22, %24, %14 : vector<8x16xi1>, vector<8x16xf32>
    %c0_10 = arith.constant 0 : index
    %c0_11 = arith.constant 0 : index
    %26 = vector.load %arg5[%c0_10, %c0_11] : memref<8x16xf32, #tpu.memory_space<vmem>>, vector<8x16xf32>
    tpu.vector_store %arg5[%c0_10, %c0_11], %25 {strides = array<i32>} : memref<8x16xf32, #tpu.memory_space<vmem>>, vector<8x16xf32>,
    return
  }
  func.func @transform_0(%arg0: i32) -> (i32, i32) {
    %c0_i32 = arith.constant 0 : i32
    %c0_i32_0 = arith.constant 0 : i32
    return %arg0, %c0_i32 : i32, i32
  }
  func.func @transform_1(%arg0: i32) -> (i32, i32) {
    %c0_i32 = arith.constant 0 : i32
    %c0_i32_0 = arith.constant 0 : i32
    %c0_i32_1 = arith.constant 0 : i32
    return %c0_i32, %c0_i32_0 : i32, i32
  }
  func.func @transform_2(%arg0: i32) -> (i32, i32) {
    %c0_i32 = arith.constant 0 : i32
    %c0_i32_0 = arith.constant 0 : i32
    %c0_i32_1 = arith.constant 0 : i32
    return %c0_i32, %c0_i32_0 : i32, i32
  }
  func.func @transform_3(%arg0: i32) -> (i32, i32) {
    %c0_i32 = arith.constant 0 : i32
    %c0_i32_0 = arith.constant 0 : i32
    %c0_i32_1 = arith.constant 0 : i32
    return %c0_i32, %c0_i32_0 : i32, i32
  }
  func.func @transform_4(%arg0: i32) -> (i32, i32) {
    %c0_i32 = arith.constant 0 : i32
    %c0_i32_0 = arith.constant 0 : i32
    return %arg0, %c0_i32 : i32, i32
  }
}

</mosaic_0001>

<bundles_post_ra>
// kernel: tpu_custom_call.1
= control target key start
LH: loop header
LB: loop body
LE: loop exit
PB: predicated region body
PF: predicated region fallthrough
CT: control target
= control target key end

     0   :  { %s193_s0 = inlined_call_operand.vmem [shape: f32[8,32], index: 0, kind: input, shape index: {}]   ;;  %s194_s1 = inlined_call_operand.vmem [shape: f32[32,16], index: 1, kind: input, shape index: {}]   ;;  %s195_s2 = inlined_call_operand.vmem [shape: f32[1,16], index: 2, kind: input, shape index: {}]   ;;  %s196_s3 = inlined_call_operand.vmem [shape: f32[1,16], index: 3, kind: input, shape index: {}]   ;;  %s197_s4 = inlined_call_operand.hbm [shape: f32[8,16], index: 4, kind: output, shape index: {}]  }
   0x1   :  { %v22_v0 = vld [vmem:[%s194_s1 + $0x18] sm:$0xff]  ;;  %v21_v1 = vld [vmem:[%s194_s1 + $0x10] sm:$0xff]  ;;  %v20_v2 = vld [vmem:[%s194_s1 + $0x8] sm:$0xff] }
   0x2   :  { %43 = vmatpush.msra.mxu0 %v22_v0 }
   0x3   :  { %9 = vsyncpa [#allocation3], 0  ;;  %v19_v3 = vld [vmem:[%s194_s1] sm:$0xff]  ;;  %vm27_vm0 = vcmask 261120   ;;  %vm51_vm1 = vcmask 130048   ;;  %v84_v29 = vlaneseq  ;;  %s96_s30 = sshll.u32 %s197_s4, 4  ;;  %s97_s30 = int_to_ptr.hbm [resolvable:$true] %s96_s30 }
   0x4   :  { %44 = vmatpush.msra.mxu0 %v21_v1  ;;  %v18_v4 = vld [vmem:[%s193_s0] sm:$0xff] }
   0x5   :  { %v107_v5 = vld [vmem:[%s195_s2] ss:$0 sm:$0xff]  ;;  %v85_v30 = vand.u32 127, %v84_v29  ;;  %s139_s2 = smov [#allocation2]  }
   0x6   :  { %45 = vmatpush.msra.mxu0 %v20_v2  ;;  %v108_v24 = vld [vmem:[%s196_s3] ss:$0 sm:$0xff]  ;;  %s94_s27 = sshll.u32 %s139_s2, 4  ;;  %s95_s27 = int_to_ptr.vmem [resolvable:$true] %s94_s27 }
   0x7   :  { %vm86_vm6 = vcmp.eq.s32.totalorder %v85_v30, 10 }
   0x8   :  { %46 = vmatpush.msra.mxu0 %v19_v3 }
   0x9   :  { %105 = vmatmul.msk.f32.vlgmr.msra.gmra.mxu0 %vm27_vm0, %v18_v4 }
  0x86   :  { %v48_v6 = vpop.f32.mrf.mxu0 }
  0x87   :  { %v49_v7 = vadd.f32 %v107_v5, %v48_v6 }
  0x89   :  { %v52_v8 = vsel %vm51_vm1, %v49_v7, -inf }
  0x8a   :  { %53 = vmax.xlane.f32.xlu0 %v52_v8 }
  0xfd   :  { %v54_v9 = vpop.xlane.xlu0 %53 }
  0xfe   :  { %v55_v10 = vsub.f32 %v49_v7, %v54_v9 }
 0x100   :  { %v56_v11 = vmul.f32 1.442695, %v55_v10 }
 0x102   :  { %109 = vpow2.f32 %v56_v11 }
 0x108   :  { %v110_v12 = vpop.eup %109 }
 0x109   :  { %v58_v13 = vsel %vm51_vm1, %v110_v12, 0.0 }
 0x10a   :  { %59 = vadd.xlane.f32.xlu0 %v58_v13 }
 0x17d   :  { %v60_v14 = vpop.xlane.xlu0 %59 }
 0x17e   :  { %111 = vrcp.f32 %v60_v14  ;;  %v72_v18 = vand.u32 2147483648, %v60_v14  ;;  %v70_v20 = vand.u32 2147483647, %v60_v14  ;;  %vm66_vm3 = vweird.f32 %v60_v14 }
 0x180   :  { %v73_v22 = vor.u32 1.1754944e-38, %v72_v18  ;;  %vm71_vm5 = vcmp.eq.f32.partialorder %v70_v20, 8.507059e+37 }
 0x184   :  { %v112_v15 = vpop.eup %111 }
 0x185   :  { %v62_v16 = vmul.f32 %v112_v15, %v60_v14  ;;  %vm67_vm2 = vweird.f32 %v112_v15 }
 0x186   :  { %vm68_vm4 = vmor %vm66_vm3, %vm67_vm2 }
 0x187   :  { %v63_v17 = vsub.f32 1.0, %v62_v16 }
 0x189   :  { %v64_v19 = vmul.f32 %v112_v15, %v63_v17 }
 0x18b   :  { %v65_v21 = vadd.f32 %v112_v15, %v64_v19 }
 0x18d   :  { %v69_v23 = vsel %vm68_vm4, %v112_v15, %v65_v21 }
 0x18e   :  { %v74_v25 = vsel %vm71_vm5, %v73_v22, %v69_v23 }
 0x18f   :  { %v75_v26 = vmul.f32 %v110_v12, %v74_v25 }
 0x191   :  { %v80_v27 = vmul.f32 %v108_v24, %v75_v26 }
 0x193   :  { %v81_v28 = vsel %vm51_vm1, %v80_v27, 0.0 }
 0x194   :  { %82 = vadd.xlane.f32.xlu1 %v81_v28 }
 0x207   :  { %v83_v31 = vpop.xlane.xlu1 %82 }
 0x208   :  { %v87_v32 = vsel %vm86_vm6, %v83_v31, %v75_v26 }
 0x209   :  { %88 = vst.msk [vmem:[#allocation2] sm:$0xff] %vm51_vm1, %v87_v32 }
 0x20a   :  { %99 = dma.vmem_to_hbm [thread:$0]  %s95_s27, 128, %s97_s30, [#allocation3]  }
 0x20b   :  { %137 = dma.done.wait [#allocation3], 128  }
 0x20c   :  { %138 = vsyncadd [#allocation3], 4294967168 }
 0x20d   :  { %104 = vsyncpa [#allocation3], 1 }

</bundles_post_ra>
